<compile_context>
chip_gen: v5e
topology: v5e:2x2
jax: 0.10.0
libtpu: 0.0.40
codegen_flags: <defaults>
</compile_context>

<pallas_src>
import jax
import jax.numpy as jnp
from jax.experimental import pallas as pl
from jax.experimental.pallas import tpu as pltpu


_LANE = 128      # vreg lane width / MXU column granularity
_SUBLANE = 8     # f32 sublane granularity


def _round_up(x, m):
    return ((x + m - 1) // m) * m


def _pick_div_tile(total, block, unit):
    """Largest multiple of `unit` <= min(block, total) that divides `total`.
    `total` must be a multiple of `unit`."""
    cap = min(_round_up(block, unit), total)
    cap = max(unit, (cap // unit) * unit)
    for cand in range(cap, unit - 1, -unit):
        if total % cand == 0:
            return cand
    return unit


def _pick_batch_tile(b_pad, block_batch):
    """Batch tile: multiple of 8, divides b_pad, and (when b_pad > 8) gives at
    least 2 grid steps so the pipeline is 2-deep and the batch axis can be
    split across the two v7x TensorCores."""
    cap = min(_round_up(block_batch, _SUBLANE), b_pad)
    if b_pad > _SUBLANE:
        cap = min(cap, max(_SUBLANE, (b_pad // 2) // _SUBLANE * _SUBLANE))
    return _pick_div_tile(b_pad, cap, _SUBLANE)


# ---------------------------------------------------------------------------
# Kernel: o[i, j] = sum_k x[i, k] @ wt[k, j], accumulated in the resident f32
# output block (reduction axis k is the last, "arbitrary", grid axis).
# ---------------------------------------------------------------------------

def _make_matmul_kernel(precision):
    def kernel(x_ref, wt_ref, o_ref):
        # The module's x.float()/bf16 cast happens here, on-chip (cheap VPU op,
        # no extra HBM round trip); MXU operands are the weight's dtype,
        # accumulation is f32 via preferred_element_type.
        part = jnp.dot(
            x_ref[...].astype(wt_ref.dtype),
            wt_ref[...],
            preferred_element_type=jnp.float32,
            precision=precision,
        )
        k = pl.program_id(2)

        @pl.when(k == 0)
        def _first():
            o_ref[...] = part

        @pl.when(k != 0)
        def _accum():
            o_ref[...] += part

    return kernel


# ---------------------------------------------------------------------------
# Weight preparation (hoisted out of the per-call path)
# ---------------------------------------------------------------------------

def prepare_coeffs_weight(weight, dtype=jnp.bfloat16):
    """weight: (n_features, n_combinations), nn.Linear layout.

    Returns (wt, n_features) where wt is (n_combinations, n_feat_pad) in
    `dtype` (bf16 by default -> single-pass MXU matmuls, half the HBM/VMEM
    bytes) and n_feat_pad is a multiple of 128 (lane-dense output stores).
    Call once per weight; do NOT redo this every forward call.
    """
    n_feat, _ = weight.shape
    n_feat_pad = _round_up(max(n_feat, 1), _LANE)
    wt = jnp.asarray(weight).T.astype(dtype)
    if n_feat_pad != n_feat:
        wt = jnp.pad(wt, ((0, 0), (0, n_feat_pad - n_feat)))
    return wt, n_feat


# ---------------------------------------------------------------------------
# Forward
# ---------------------------------------------------------------------------

def coeffs_network_forward_prepared(
    x,
    wt,
    n_features,
    *,
    block_batch=1024,
    block_n=512,
    block_k=512,
    vmem_budget_bytes=48 * 1024 * 1024,
    precision=None,
):
    """y = x.float() @ W.T using a prepared weight from prepare_coeffs_weight.

    x  : (B, n_combinations), any float dtype (cast on-chip to wt.dtype)
    wt : (n_combinations, n_feat_padded), n_feat_padded % 128 == 0
    Returns (B, n_features) float32.
    """
    B, n_comb = x.shape
    n_comb_w, n_feat_pad = wt.shape
    assert n_comb == n_comb_w, "x / weight n_combinations mismatch"
    assert n_feat_pad % _LANE == 0, "use prepare_coeffs_weight()"

    x_item = x.dtype.itemsize
    w_item = wt.dtype.itemsize

    # --- batch tiling: tb divides round_up(B, 8) -> at most 7 padded rows ----
    b_pad = _round_up(max(B, 1), _SUBLANE)
    tb = _pick_batch_tile(b_pad, block_batch)

    # --- N tiling: 128-multiple divisor of n_feat_pad (no extra N padding) ---
    tn = _pick_div_tile(n_feat_pad, block_n, _LANE)

    # --- K tiling: keep K whole when it fits one panel, else pad to 128 ------
    if n_comb <= max(_round_up(block_k, _LANE), _LANE):
        k_pad, tk = n_comb, n_comb
    else:
        k_pad = _round_up(n_comb, _LANE)
        tk = _pick_div_tile(k_pad, block_k, _LANE)

    # --- VMEM budgeting: shrink tiles until the per-step working set fits ----
    def _working_set(tb_, tn_, tk_, k_pad_):
        w_bufs = 1 if (tn_ == n_feat_pad and tk_ == k_pad_) else 2  # Buffered(1)
        return (2 * tb_ * tk_ * x_item          # double-buffered x tiles
                + w_bufs * tk_ * tn_ * w_item   # weight tile(s)
                + 2 * tb_ * tn_ * 4)            # double-buffered f32 out tiles

    while _working_set(tb, tn, tk, k_pad) > vmem_budget_bytes:
        if tb > _SUBLANE:
            tb = _pick_div_tile(b_pad, max(_SUBLANE, tb // 2), _SUBLANE)
        elif tn > _LANE:
            tn = _pick_div_tile(n_feat_pad, max(_LANE, tn // 2), _LANE)
        elif tk > _LANE:
            k_pad = _round_up(n_comb, _LANE)
            tk = _pick_div_tile(k_pad, max(_LANE, tk // 2), _LANE)
        else:
            break

    # --- pad (zeros contribute nothing to the product) -----------------------
    if b_pad != B:
        x = jnp.pad(x, ((0, b_pad - B), (0, 0)))          # <= 7 rows
    if k_pad != n_comb:
        # Only when K must be tiled; hoist into weight prep for repeated use.
        x = jnp.pad(x, ((0, 0), (0, k_pad - n_comb)))
        wt = jnp.pad(wt, ((0, k_pad - n_comb), (0, 0)))

    bt, nt, kt = b_pad // tb, n_feat_pad // tn, k_pad // tk

    # --- grid-axis order: stream the larger operand fewer times --------------
    w_bytes = k_pad * n_feat_pad * w_item
    x_bytes = b_pad * k_pad * x_item
    cost_batch_outer = bt * w_bytes + (nt if kt > 1 else 1) * x_bytes
    cost_n_outer = (bt if kt > 1 else 1) * w_bytes + nt * x_bytes
    if cost_n_outer < cost_batch_outer:
        grid = (nt, bt, kt)
        x_map = lambda j, i, k: (i, k)
        w_map = lambda j, i, k: (k, j)
        o_map = lambda j, i, k: (i, j)
    else:
        grid = (bt, nt, kt)
        x_map = lambda i, j, k: (i, k)
        w_map = lambda i, j, k: (k, j)
        o_map = lambda i, j, k: (i, j)

    # Grid-invariant weight -> single VMEM buffer (frees VMEM for x/out tiles).
    if nt == 1 and kt == 1:
        w_spec = pl.BlockSpec((tk, tn), w_map, pipeline_mode=pl.Buffered(1))
    else:
        w_spec = pl.BlockSpec((tk, tn), w_map)

    y = pl.pallas_call(
        _make_matmul_kernel(precision),
        out_shape=jax.ShapeDtypeStruct((b_pad, n_feat_pad), jnp.float32),
        grid=grid,
        in_specs=[pl.BlockSpec((tb, tk), x_map), w_spec],
        out_specs=pl.BlockSpec((tb, tn), o_map),
        compiler_params=pltpu.CompilerParams(
            dimension_semantics=("parallel", "parallel", "arbitrary"),
            vmem_limit_bytes=int(vmem_budget_bytes),
        ),
    )(x, wt)

    # Strip batch / lane padding (module semantics: exact (B, n_features)).
    if b_pad != B or n_feat_pad != n_features:
        y = y[:B, :n_features]
    return y


def coeffs_network_forward(x, weight, *, high_precision=False, **kwargs):
    """Convenience wrapper taking the raw (n_features, n_combinations) weight.

    high_precision=True keeps the weight (and MXU operands) in f32; for strict
    f32 parity with PyTorch additionally pass
    precision=jax.lax.Precision.HIGHEST (multi-pass MXU, slower).
    For repeated calls with a static weight, call prepare_coeffs_weight() once
    and use coeffs_network_forward_prepared directly.
    """
    dtype = jnp.float32 if high_precision else jnp.bfloat16
    wt, n_feat = prepare_coeffs_weight(weight, dtype=dtype)
    return coeffs_network_forward_prepared(x, wt, n_feat, **kwargs)


# ---------------------------------------------------------------------------
# Init matching the module (__init__): xavier-uniform, optionally zeroed.
# ---------------------------------------------------------------------------

def init_coeffs_weight(key, n_combinations, n_features, zero_inits=True):
    bound = jnp.sqrt(6.0 / (n_combinations + n_features))  # xavier_uniform, gain=1
    w = jax.random.uniform(
        key, (n_features, n_combinations), jnp.float32, -bound, bound
    )
    return jnp.zeros_like(w) if zero_inits else w


def _bf16_exact(a):
    # Round test data to bf16-representable values (stored in original width)
    # so the bf16-operand MXU matmul and the f32 XLA reference agree tightly.
    return a.astype(jnp.bfloat16).astype(a.dtype)


if __name__ == "__main__":
    key = jax.random.PRNGKey(0)
    kx, kw, kx2, kw2 = jax.random.split(key, 4)

    # --- 1) Module-sized shapes: n_features=16 (<128 lanes) exercises the
    #        lane-padded output, grid-invariant Buffered(1) weight, and >=2
    #        parallel batch tiles. x kept f32 (module input), cast on-chip. ---
    batch, n_comb, n_feat = 16, 32, 16
    x = _bf16_exact(jax.random.normal(kx, (batch, n_comb), jnp.float32))

    for zero_inits in (True, False):
        w = _bf16_exact(init_coeffs_weight(kw, n_comb, n_feat, zero_inits=zero_inits))
        wt, nf = prepare_coeffs_weight(w)                 # hoisted weight prep (bf16)
        y = jax.block_until_ready(coeffs_network_forward_prepared(x, wt, nf))
        y_ref = x.astype(jnp.float32) @ w.T
        assert y.shape == (batch, n_feat), y.shape
        assert y.dtype == jnp.float32, y.dtype
        assert jnp.allclose(y, y_ref, atol=1e-4, rtol=1e-4), (
            f"mismatch (zero_inits={zero_inits})"
        )

    # --- 1b) f32-operand path (high_precision flag) on the same shapes. ------
    y_hp = jax.block_until_ready(coeffs_network_forward(x, w, high_precision=True))
    assert jnp.allclose(y_hp, x.astype(jnp.float32) @ w.T, atol=1e-4, rtol=1e-4)

    # --- 1c) Ragged batch: exercises the <=7-row pad + output slice. ---------
    xr = x[:10]
    yr = jax.block_until_ready(coeffs_network_forward_prepared(xr, wt, nf))
    assert yr.shape == (10, n_feat)
    assert jnp.allclose(yr, xr.astype(jnp.float32) @ w.T, atol=1e-4, rtol=1e-4)

    # --- 2) Moderate shapes exercising the batch/N/K-tiled path (bf16 x kept
    #        native, bf16 weight, f32 accumulation into the output block). ----
    B2, K2, N2 = 192, 384, 256
    x2 = jax.random.normal(kx2, (B2, K2), jnp.float32).astype(jnp.bfloat16)
    w2 = _bf16_exact(init_coeffs_weight(kw2, K2, N2, zero_inits=False))
    y2 = jax.block_until_ready(
        coeffs_network_forward(x2, w2, block_batch=64, block_n=128, block_k=128)
    )
    y2_ref = x2.astype(jnp.float32) @ w2.T
    assert y2.shape == (B2, N2), y2.shape
    assert y2.dtype == jnp.float32, y2.dtype
    assert jnp.allclose(y2, y2_ref, atol=1e-3, rtol=1e-3), "tiled path mismatch"

    print("KERNEL_OK")
</pallas_src>

<mosaic_0001>
module attributes {stable_mosaic.version = 11 : i64} {
  func.func @kernel(%arg0: i32, %arg1: i32, %arg2: i32, %arg3: memref<8x32xf32, #tpu.memory_space<vmem>>, %arg4: memref<32x128xbf16, #tpu.memory_space<vmem>>, %arg5: memref<8x128xf32, #tpu.memory_space<vmem>>) attributes {dimension_semantics = [#tpu.dimension_semantics<parallel>, #tpu.dimension_semantics<parallel>, #tpu.dimension_semantics<arbitrary>], iteration_bounds = array<i64: 1, 2, 1>, scalar_prefetch = 0 : i64, scratch_operands = 0 : i64, tpu.core_type = #tpu.core_type<tc>, window_params = [{transform_indices = @transform_0, window_bounds = array<i64: 8, 32>}, {pipeline_mode = #tpu.pipeline_mode<synchronous>, transform_indices = @transform_1, window_bounds = array<i64: 32, 128>}, {transform_indices = @transform_2, window_bounds = array<i64: 8, 128>}]} {
    %c0 = arith.constant 0 : index
    %c0_0 = arith.constant 0 : index
    %0 = vector.load %arg3[%c0, %c0_0] : memref<8x32xf32, #tpu.memory_space<vmem>>, vector<8x32xf32>
    %1 = arith.truncf %0 : vector<8x32xf32> to vector<8x32xbf16>
    %c0_1 = arith.constant 0 : index
    %c0_2 = arith.constant 0 : index
    %2 = vector.load %arg4[%c0_1, %c0_2] : memref<32x128xbf16, #tpu.memory_space<vmem>>, vector<32x128xbf16>
    %cst = arith.constant dense<0.000000e+00> : vector<8x128xf32>
    %3 = tpu.matmul %1, %2, %cst {dimension_numbers = #tpu.dot_dimension_numbers<[1], [0], [0], [1], [0, 0, 1, 1], [], []>} : vector<8x32xbf16>, vector<32x128xbf16>, vector<8x128xf32> -> vector<8x128xf32>
    %c0_i32 = arith.constant 0 : i32
    %4 = arith.cmpi eq, %arg2, %c0_i32 : i32
    %5 = arith.extui %4 : i1 to i32
    %c0_i32_3 = arith.constant 0 : i32
    %6 = arith.cmpi ne, %5, %c0_i32_3 : i32
    scf.if %6 {
      %c0_6 = arith.constant 0 : index
      %c0_7 = arith.constant 0 : index
      %10 = vector.load %arg5[%c0_6, %c0_7] : memref<8x128xf32, #tpu.memory_space<vmem>>, vector<8x128xf32>
      tpu.vector_store %arg5[%c0_6, %c0_7], %3 {strides = array<i32>} : memref<8x128xf32, #tpu.memory_space<vmem>>, vector<8x128xf32>,
    } else {
    }
    %c0_i32_4 = arith.constant 0 : i32
    %7 = arith.cmpi ne, %arg2, %c0_i32_4 : i32
    %8 = arith.extui %7 : i1 to i32
    %c0_i32_5 = arith.constant 0 : i32
    %9 = arith.cmpi ne, %8, %c0_i32_5 : i32
    scf.if %9 {
      %c0_6 = arith.constant 0 : index
      %c0_7 = arith.constant 0 : index
      %10 = vector.load %arg5[%c0_6, %c0_7] : memref<8x128xf32, #tpu.memory_space<vmem>>, vector<8x128xf32>
      %11 = arith.addf %10, %3 : vector<8x128xf32>
      %c0_8 = arith.constant 0 : index
      %c0_9 = arith.constant 0 : index
      %12 = vector.load %arg5[%c0_8, %c0_9] : memref<8x128xf32, #tpu.memory_space<vmem>>, vector<8x128xf32>
      tpu.vector_store %arg5[%c0_8, %c0_9], %11 {strides = array<i32>} : memref<8x128xf32, #tpu.memory_space<vmem>>, vector<8x128xf32>,
    } else {
    }
    return
  }
  func.func @transform_0(%arg0: i32, %arg1: i32, %arg2: i32) -> (i32, i32) {
    %c0_i32 = arith.constant 0 : i32
    return %arg1, %arg2 : i32, i32
  }
  func.func @transform_1(%arg0: i32, %arg1: i32, %arg2: i32) -> (i32, i32) {
    %c0_i32 = arith.constant 0 : i32
    return %arg2, %arg0 : i32, i32
  }
  func.func @transform_2(%arg0: i32, %arg1: i32, %arg2: i32) -> (i32, i32) {
    %c0_i32 = arith.constant 0 : i32
    return %arg1, %arg0 : i32, i32
  }
}

</mosaic_0001>

<bundles_post_ra>
// kernel: tpu_custom_call.1
= control target key start
LH: loop header
LB: loop body
LE: loop exit
PB: predicated region body
PF: predicated region fallthrough
CT: control target
= control target key end

     0   :  { %7 = vsyncpa [#allocation3], 0  ;;  %s786_s0 = inlined_call_operand.hbm [shape: f32[16,32], index: 0, kind: input, shape index: {}]   ;;  %s787_s1 = inlined_call_operand.hbm [shape: bf16[32,128], index: 1, kind: input, shape index: {}]   ;;  %s788_s2 = inlined_call_operand.hbm [shape: f32[16,128], index: 2, kind: output, shape index: {}]  }
   0x1   :  { %9 = vsyncpa [#allocation3 + $0x1], 0 }
   0x2   :  { %10 = vsyncpa [#allocation6], 0 }
   0x3   :  { %11 = vsyncpa [#allocation4], 0 }
   0x4   :  { %13 = vsyncpa [#allocation4 + $0x1], 0  ;;  %s643_s9 = smov 0   ;;  %s645_s10 = smov 0  }
   0x5   :  { %s647_s11 = smov 0   ;;  %s649_s12 = smov 0  }
   0x6   :  { %s651_s13 = smov 0   ;;  %s653_s14 = smov 0  }
   0x7 LB: > { %s376_s15 = sadd.s32 4294967295, %s623_s14   ;;  %p378_p0 = scmp.ge.s32.totalorder %s623_s14, 1  ;;  %s623_s14 = sphi %s653_s14, %s19_s14   ;;  %s619_s13 = sphi %s651_s13, %s799_s13   ;;  %s615_s12 = sphi %s649_s12, %s798_s12   ;;  %s611_s11 = sphi %s647_s11, %s797_s11   ;;  %s607_s10 = sphi %s645_s10, %s796_s10   ;;  %s603_s9 = sphi %s643_s9, %s795_s9  }
   0x8   : > { %p675_p1 = scmp.eq.s32.totalorder %s376_s15, 0  ;;  %p127_p2 = scmp.lt.s32.totalorder %s623_s14, 3 }
   0x9   : > { %s142_s19 = sshll.u32 %s787_s1, 4  ;;  %s625_s21 = smov [#allocation5]   ;;  %s143_s19 = int_to_ptr.hbm [resolvable:$true] %s142_s19 }
   0xa   : > { %p683_p3 = pnand %p378_p0, %p127_p2  ;;  %s144_s22 = sshll.u32 %s625_s21, 4  ;;  %s145_s22 = int_to_ptr.vmem [resolvable:$true] %s144_s22 }
   0xb   : > { %p380_p6 = scmp.ge.s32.totalorder %s623_s14, 2  ;;  %s626_s23 = smov 64  }
   0xc   : > { %p410_p4 = pneg %p683_p3  ;;  %s627_s24 = smov 4  }
   0xd   : > { %s377_s25 = sadd.s32 4294967294, %s623_s14   ;;  %s34_s26 = sadd.s32 1, %s619_s13 }
   0xe   : > { %p411_p5 = pnand %p410_p4, %p675_p1  ;;  %s47_s27 = sadd.s32 1, %s611_s11 }
   0xf   : > { %p36_p7 = scmp.ge.s32.totalorder %s34_s26, 2  ;;  %p54_p8 = scmp.ne.s32.totalorder %s611_s11, %s607_s10 }
  0x10   : > { %413 = dma.hbm_to_vmem [thread:$0]  (!%p411_p5), %s143_s19, 256, %s145_s22, [#allocation6], %s626_s23, %s626_s23, %s627_s24  }
  0x11   : > { %p55_p9 = scmp.eq.s32.totalorder %s623_s14, 0  ;;  %p60_p10 = scmp.ne.s32.totalorder %s607_s10, %s603_s9 }
  0x12   : > { %s801_s26 = smov (%p36_p7, %s34_s26), 0  ;;  %p114_p13 = scmp.eq.s32.totalorder %s376_s15, 1 }
  0x13   : > { %p702_p11 = por %p55_p9, %p54_p8  ;;  %p708_p12 = por %p675_p1, %p60_p10 }
  0x14   : > { %s42_s30 = ssub.s32 %s619_s13, %s801_s26  ;;  %p120_p2 = scmp.eq.s32.totalorder %s377_s25, 1 }
  0x15   : > { %p45_p0 = scmp.eq.s32.totalorder %s42_s30, 0  ;;  %p714_p4 = por %p114_p13, %p54_p8 }
  0x16   : > { %p423_p5 = scmp.lt.s32.totalorder %s623_s14, 2  ;;  %p722_p7 = por %p120_p2, %p60_p10 }
  0x17   : > { %s720_s4 = scalar_select %p45_p0, %s611_s11, %s47_s27  }
  0x18   : > { %s158_s6 = sand.u32 1, %s611_s11   ;;  %s382_s8 = sshll.u32 %s619_s13, 3 }
  0x19   : > { %s381_s7 = sshll.u32 %s158_s6, 3  ;;  %s167_s15 = scalar_lea.hbm %s786_s0, %s382_s8 }
  0x1a   : > { %s162_s19 = scalar_lea.vmem [#allocation2], %s381_s7  ;;  %s169_s22 = sshll.u32 %s167_s15, 4  ;;  %s170_s22 = int_to_ptr.hbm [resolvable:$true] %s169_s22 }
  0x1b   : > { %s171_s21 = sshll.u32 %s162_s19, 4  ;;  %p415_p8 = pnand %p423_p5, %p702_p11  ;;  %s172_s21 = int_to_ptr.vmem [resolvable:$true] %s171_s21 }
  0x1c   : > { %s159_s23 = scalar_lea.sflag [#allocation3], %s158_s6  ;;  %180 = sbr.rel (%p683_p3) target bundleno = 178 (0xb2), region = 28 }
  0x1d   : > { %417 = dma.hbm_to_vmem [thread:$0]  (!%p415_p8), %s170_s22, 128, %s172_s21, %s159_s23  }
  0x1e   : > { %s736_s24 = sand.u32 (!%p683_p3), 1, %s607_s10  }
  0x1f   : > { %s384_s25 = sshll.u32 (!%p683_p3), %s736_s24, 3  ;;  %s183_s27 = scalar_lea.sflag (!%p683_p3), [#allocation3], %s736_s24 }
  0x20   : > { %s186_s30 = scalar_lea.vmem (!%p683_p3), [#allocation2], %s384_s25 }
  0x21   : > { %590 = dma.done.wait (%p708_p12), %s183_s27, 128  }
  0x22   : > { %592 = vsyncadd (%p708_p12), %s183_s27, 4294967168 }
  0x23   : > { %594 = dma.done.wait (%p675_p1), [#allocation6], 256  }
  0x24   : > { %596 = vsyncadd (%p675_p1), [#allocation6], 4294967040  ;;  %v401_v0 = vld [vmem:[#allocation5 + $0x8] sm:$0xff]  ;;  %v400_v1 = vld [vmem:[#allocation5] sm:$0xff]  ;;  %vm233_vm0 = vcmask 261120   ;;  %s397_s20 = sshll.u32 %s615_s12, 3 }
  0x25   : > { %243 = vmatpush.bf16.msra.mxu0 %v401_v0  ;;  %v215_v2 = vld [vmem:[%s186_s30] sm:$0xff]  ;;  %s274_s6 = scalar_lea.hbm %s788_s2, %s397_s20  ;;  %s212_s7 = scalar_lea.vmem [#allocation7], %s384_s25 }
  0x26   : > { %v216_v3 = vpack.c.bf16 %v215_v2, %v215_v2  ;;  %s276_s8 = sshll.u32 %s212_s7, 4  ;;  %s278_s16 = sshll.u32 %s274_s6, 4  ;;  %s277_s8 = int_to_ptr.vmem [resolvable:$true] %s276_s8  ;;  %s279_s16 = int_to_ptr.hbm [resolvable:$true] %s278_s16 }
  0x27   : > { %s263_s17 = scalar_lea.sflag [#allocation4], %s736_s24  ;;  %s551_s18 = sshra.s32 %s279_s16, 4  ;;  %s552_s18 = int_to_ptr.hbm [resolvable:$true] %s551_s18 }
  0x28   : > { %s553_s15 = scalar_lea.hbm %s552_s18, 8  ;;  %s557_s21 = scalar_lea.hbm %s788_s2, 16 }
  0x29   : > { %244 = vmatpush.bf16.msra.mxu0 %v400_v1  ;;  %p554_p1 = scmp.ne.s32.totalorder %s552_s18, %s553_s15  ;;  %p558_p10 = scmp.lt.s32.totalorder %s552_s18, %s788_s2 }
  0x2a   : > { %p559_p11 = scmp.lt.s32.totalorder %s557_s21, %s553_s15 }
  0x2b   : > { %p555_p3 = pnand %p554_p1, %p714_p4 }
  0x2c   : > { %395 = vmatmul.msk.bf16.vlgmr.msra.gmra.mxu0 %vm233_vm0, %v216_v3  ;;  %p560_p12 = por %p559_p11, %p558_p10 }
  0x2d   : > { %p556_p9 = pneg %p555_p3 }
  0x2f   : > { %p561_p13 = pnand %p560_p12, %p556_p9 }
  0xa9   : > { %v246_v4 = vpop.f32.mrf.mxu0 }
  0xaa   : > { %254 = vst [vmem:[%s212_s7] sm:$0xff] %v246_v4 }
  0xab   : > { %564 = shalt.err (!%p561_p13)
}
  0xac   : > { %408 = dma.vmem_to_hbm [thread:$0]  (%p714_p4), %s277_s8, 128, %s279_s16, %s263_s17  }
  0xb1   : > { %v248_v5 = vpop.f32.mrf.mxu0 }
  0xb2 PF: > { %s290_s24 = sand.u32 1, %s603_s9   ;;  %p419_p0 = pnand %p380_p6, %p722_p7 }
  0xb3   : > { %s291_s25 = scalar_lea.sflag [#allocation4], %s290_s24 }
  0xb4   : > { %p420_p2 = pneg %p419_p0 }
  0xb6   : > { %598 = dma.done.wait (%p420_p2), %s291_s25, 128  }
  0xb7   : > { %600 = vsyncadd (%p420_p2), %s291_s25, 4294967168  ;;  %s19_s14 = sadd.s32 1, %s623_s14   ;;  %s795_s9 = smov %s607_s10 }
  0xb8   : > { %p16_p5 = scmp.ge.s32.totalorder %s19_s14, 4   ;;  %s796_s10 = smov %s611_s11 }
  0xb9   : > { %s797_s11 = smov %s720_s4  ;;  %s798_s12 = smov %s619_s13 }
  0xba   : > { %s799_s13 = smov %s801_s26  ;;  %18 = sbr.rel (!%p16_p5) target bundleno = 7 (0x7), region = 86 }
  0xbf   :  { %297 = vsyncpa [#allocation3], 1 }
  0xc0   :  { %299 = vsyncpa [#allocation3 + $0x1], 1 }
  0xc1   :  { %300 = vsyncpa [#allocation6], 1 }
  0xc2   :  { %301 = vsyncpa [#allocation4], 1 }
  0xc3   :  { %303 = vsyncpa [#allocation4 + $0x1], 1 }

</bundles_post_ra>
